<compile_context>
chip_gen: v5e
topology: v5e:2x2
jax: 0.10.0
libtpu: 0.0.40
codegen_flags: <defaults>
</compile_context>

<pallas_src>
import jax
import jax.numpy as jnp
from jax.experimental import pallas as pl
from jax.experimental.pallas import tpu as pltpu

STATE_SIZE = 4     # CartPole-v1 observation dim
ACTION_SIZE = 2    # CartPole-v1 action dim
H1, H2, H3 = 24, 24, 12


def _round_up(n, m):
    return ((n + m - 1) // m) * m


def dqn_mlp_kernel(x_ref, w1_ref, b1_ref, w2_ref, b2_ref,
                   w3_ref, b3_ref, w4_ref, b4_ref, o_ref):
    """One batch tile of the 4-layer MLP forward pass, feature-major.

    x_ref:  (STATE_SIZE, TILE_B)   batch on the 128-lane axis
    wK_ref: (out_K, in_K)          PyTorch nn.Linear layout, VMEM-resident
    bK_ref: (out_K, 1)             broadcast along lanes
    o_ref:  (ACTION_SIZE, TILE_B)  lane-dense output store
    """
    x = x_ref[...]

    h = jnp.dot(w1_ref[...], x, preferred_element_type=jnp.float32) + b1_ref[...]
    h = jnp.maximum(h, 0.0)

    h = jnp.dot(w2_ref[...], h, preferred_element_type=jnp.float32) + b2_ref[...]
    h = jnp.maximum(h, 0.0)

    h = jnp.dot(w3_ref[...], h, preferred_element_type=jnp.float32) + b3_ref[...]
    h = jnp.maximum(h, 0.0)

    out = jnp.dot(w4_ref[...], h, preferred_element_type=jnp.float32) + b4_ref[...]
    o_ref[...] = out.astype(o_ref.dtype)


def dqn_forward(x, params, tile_b=512):
    """x: (B, STATE_SIZE) f32 (PyTorch layout).  Returns (B, ACTION_SIZE) f32.

    Batch is tiled along the grid (lane-dense tiles, multiples of 128); weights
    and biases are resident in VMEM for every grid step.  Working set per grid
    step is a few hundred KB, far under the scoped-VMEM limit on v5e/v6e/v7x.
    """
    B = x.shape[0]
    w1, b1, w2, b2, w3, b3, w4, b4 = (
        params["w1"], params["b1"], params["w2"], params["b2"],
        params["w3"], params["b3"], params["w4"], params["b4"],
    )

    # Lane-dense batch tiles (multiple of 128); tiny batches pad up to one tile.
    tile_b = max(128, min(_round_up(tile_b, 128), _round_up(B, 128)))
    b_pad = _round_up(B, tile_b)
    grid = (b_pad // tile_b,)

    # Feature-major input: (STATE_SIZE, B_pad), batch on the lane axis.
    x_t = jnp.pad(x, ((0, b_pad - B), (0, 0))).T

    resident = lambda arr: pl.BlockSpec(arr.shape, lambda i: (0, 0))

    flops = 2 * b_pad * (STATE_SIZE * H1 + H1 * H2 + H2 * H3 + H3 * ACTION_SIZE)
    param_bytes = 4 * sum(int(p.size) for p in (w1, b1, w2, b2, w3, b3, w4, b4))
    bytes_accessed = 4 * b_pad * (STATE_SIZE + ACTION_SIZE) + param_bytes

    out_t = pl.pallas_call(
        dqn_mlp_kernel,
        out_shape=jax.ShapeDtypeStruct((ACTION_SIZE, b_pad), jnp.float32),
        grid=grid,
        in_specs=[
            pl.BlockSpec((STATE_SIZE, tile_b), lambda i: (0, i)),
            resident(w1), resident(b1),
            resident(w2), resident(b2),
            resident(w3), resident(b3),
            resident(w4), resident(b4),
        ],
        out_specs=pl.BlockSpec((ACTION_SIZE, tile_b), lambda i: (0, i)),
        compiler_params=pltpu.CompilerParams(
            dimension_semantics=("parallel",)),   # v7x: shard batch over 2 TCs
        cost_estimate=pl.CostEstimate(
            flops=flops, transcendentals=0, bytes_accessed=bytes_accessed),
    )(x_t, w1, b1, w2, b2, w3, b3, w4, b4)

    # Back to PyTorch (batch, action) layout; drop batch padding.
    return out_t[:, :B].T


def init_params(key):
    """Deterministic init mirroring nn.Linear default: U(-1/sqrt(fan_in), 1/sqrt(fan_in)).

    Weights use the native PyTorch layout (out_features, in_features);
    biases are (out_features, 1) for lane-broadcast inside the kernel.
    """
    dims = [(STATE_SIZE, H1), (H1, H2), (H2, H3), (H3, ACTION_SIZE)]
    params = {}
    for i, (fan_in, fan_out) in enumerate(dims, start=1):
        key, kw, kb = jax.random.split(key, 3)
        bound = 1.0 / jnp.sqrt(jnp.float32(fan_in))
        params[f"w{i}"] = jax.random.uniform(
            kw, (fan_out, fan_in), jnp.float32, minval=-bound, maxval=bound)
        params[f"b{i}"] = jax.random.uniform(
            kb, (fan_out, 1), jnp.float32, minval=-bound, maxval=bound)
    return params


def dqn_reference(x, params):
    """Plain-JAX reference (PyTorch semantics: x @ W.T + b)."""
    h = jnp.maximum(x @ params["w1"].T + params["b1"].T, 0.0)
    h = jnp.maximum(h @ params["w2"].T + params["b2"].T, 0.0)
    h = jnp.maximum(h @ params["w3"].T + params["b3"].T, 0.0)
    return h @ params["w4"].T + params["b4"].T


if __name__ == "__main__":
    key = jax.random.PRNGKey(0)
    key, kx, kx2 = jax.random.split(key, 3)
    params = init_params(key)

    # Small single-step-style batch.
    batch = 8
    x = jax.random.normal(kx, (batch, STATE_SIZE), jnp.float32)
    out = jax.block_until_ready(dqn_forward(x, params))
    ref = dqn_reference(x, params)
    assert out.shape == (batch, ACTION_SIZE)
    assert jnp.allclose(out, ref, atol=1e-5, rtol=1e-5)

    # Multi-tile batch (exercises grid > 1 with a non-tile-aligned batch).
    batch2 = 384
    x2 = jax.random.normal(kx2, (batch2, STATE_SIZE), jnp.float32)
    out2 = jax.block_until_ready(dqn_forward(x2, params, tile_b=128))
    ref2 = dqn_reference(x2, params)
    assert out2.shape == (batch2, ACTION_SIZE)
    assert jnp.allclose(out2, ref2, atol=1e-5, rtol=1e-5)

    print("KERNEL_OK")
</pallas_src>

<mosaic_0001>
module attributes {stable_mosaic.version = 11 : i64} {
  func.func @dqn_mlp_kernel(%arg0: i32, %arg1: memref<4x128xf32, #tpu.memory_space<vmem>>, %arg2: memref<24x4xf32, #tpu.memory_space<vmem>>, %arg3: memref<24x1xf32, #tpu.memory_space<vmem>>, %arg4: memref<24x24xf32, #tpu.memory_space<vmem>>, %arg5: memref<24x1xf32, #tpu.memory_space<vmem>>, %arg6: memref<12x24xf32, #tpu.memory_space<vmem>>, %arg7: memref<12x1xf32, #tpu.memory_space<vmem>>, %arg8: memref<2x12xf32, #tpu.memory_space<vmem>>, %arg9: memref<2x1xf32, #tpu.memory_space<vmem>>, %arg10: memref<2x128xf32, #tpu.memory_space<vmem>>) attributes {dimension_semantics = [#tpu.dimension_semantics<parallel>], iteration_bounds = array<i64: 1>, scalar_prefetch = 0 : i64, scratch_operands = 0 : i64, tpu.core_type = #tpu.core_type<tc>, window_params = [{transform_indices = @transform_0, window_bounds = array<i64: 4, 128>}, {pipeline_mode = #tpu.pipeline_mode<synchronous>, transform_indices = @transform_1, window_bounds = array<i64: 24, 4>}, {pipeline_mode = #tpu.pipeline_mode<synchronous>, transform_indices = @transform_2, window_bounds = array<i64: 24, 1>}, {pipeline_mode = #tpu.pipeline_mode<synchronous>, transform_indices = @transform_3, window_bounds = array<i64: 24, 24>}, {pipeline_mode = #tpu.pipeline_mode<synchronous>, transform_indices = @transform_4, window_bounds = array<i64: 24, 1>}, {pipeline_mode = #tpu.pipeline_mode<synchronous>, transform_indices = @transform_5, window_bounds = array<i64: 12, 24>}, {pipeline_mode = #tpu.pipeline_mode<synchronous>, transform_indices = @transform_6, window_bounds = array<i64: 12, 1>}, {pipeline_mode = #tpu.pipeline_mode<synchronous>, transform_indices = @transform_7, window_bounds = array<i64: 2, 12>}, {pipeline_mode = #tpu.pipeline_mode<synchronous>, transform_indices = @transform_8, window_bounds = array<i64: 2, 1>}, {transform_indices = @transform_9, window_bounds = array<i64: 2, 128>}]} {
    %c0 = arith.constant 0 : index
    %c0_0 = arith.constant 0 : index
    %0 = vector.load %arg1[%c0, %c0_0] : memref<4x128xf32, #tpu.memory_space<vmem>>, vector<4x128xf32>
    %c0_1 = arith.constant 0 : index
    %c0_2 = arith.constant 0 : index
    %1 = vector.load %arg2[%c0_1, %c0_2] : memref<24x4xf32, #tpu.memory_space<vmem>>, vector<24x4xf32>
    %cst = arith.constant dense<0.000000e+00> : vector<24x128xf32>
    %2 = tpu.matmul %1, %0, %cst {dimension_numbers = #tpu.dot_dimension_numbers<[1], [0], [0], [1], [0, 0, 1, 1], [], []>} : vector<24x4xf32>, vector<4x128xf32>, vector<24x128xf32> -> vector<24x128xf32>
    %c0_3 = arith.constant 0 : index
    %c0_4 = arith.constant 0 : index
    %3 = vector.load %arg3[%c0_3, %c0_4] : memref<24x1xf32, #tpu.memory_space<vmem>>, vector<24x1xf32>
    %4 = vector.broadcast %3 : vector<24x1xf32> to vector<24x128xf32>
    %5 = arith.addf %2, %4 : vector<24x128xf32>
    %cst_5 = arith.constant 0.000000e+00 : f32
    %6 = vector.broadcast %cst_5 : f32 to vector<24x128xf32>
    %7 = arith.maximumf %5, %6 : vector<24x128xf32>
    %c0_6 = arith.constant 0 : index
    %c0_7 = arith.constant 0 : index
    %8 = vector.load %arg4[%c0_6, %c0_7] : memref<24x24xf32, #tpu.memory_space<vmem>>, vector<24x24xf32>
    %cst_8 = arith.constant dense<0.000000e+00> : vector<24x128xf32>
    %9 = tpu.matmul %8, %7, %cst_8 {dimension_numbers = #tpu.dot_dimension_numbers<[1], [0], [0], [1], [0, 0, 1, 1], [], []>} : vector<24x24xf32>, vector<24x128xf32>, vector<24x128xf32> -> vector<24x128xf32>
    %c0_9 = arith.constant 0 : index
    %c0_10 = arith.constant 0 : index
    %10 = vector.load %arg5[%c0_9, %c0_10] : memref<24x1xf32, #tpu.memory_space<vmem>>, vector<24x1xf32>
    %11 = vector.broadcast %10 : vector<24x1xf32> to vector<24x128xf32>
    %12 = arith.addf %9, %11 : vector<24x128xf32>
    %cst_11 = arith.constant 0.000000e+00 : f32
    %13 = vector.broadcast %cst_11 : f32 to vector<24x128xf32>
    %14 = arith.maximumf %12, %13 : vector<24x128xf32>
    %c0_12 = arith.constant 0 : index
    %c0_13 = arith.constant 0 : index
    %15 = vector.load %arg6[%c0_12, %c0_13] : memref<12x24xf32, #tpu.memory_space<vmem>>, vector<12x24xf32>
    %cst_14 = arith.constant dense<0.000000e+00> : vector<12x128xf32>
    %16 = tpu.matmul %15, %14, %cst_14 {dimension_numbers = #tpu.dot_dimension_numbers<[1], [0], [0], [1], [0, 0, 1, 1], [], []>} : vector<12x24xf32>, vector<24x128xf32>, vector<12x128xf32> -> vector<12x128xf32>
    %c0_15 = arith.constant 0 : index
    %c0_16 = arith.constant 0 : index
    %17 = vector.load %arg7[%c0_15, %c0_16] : memref<12x1xf32, #tpu.memory_space<vmem>>, vector<12x1xf32>
    %18 = vector.broadcast %17 : vector<12x1xf32> to vector<12x128xf32>
    %19 = arith.addf %16, %18 : vector<12x128xf32>
    %cst_17 = arith.constant 0.000000e+00 : f32
    %20 = vector.broadcast %cst_17 : f32 to vector<12x128xf32>
    %21 = arith.maximumf %19, %20 : vector<12x128xf32>
    %c0_18 = arith.constant 0 : index
    %c0_19 = arith.constant 0 : index
    %22 = vector.load %arg8[%c0_18, %c0_19] : memref<2x12xf32, #tpu.memory_space<vmem>>, vector<2x12xf32>
    %cst_20 = arith.constant dense<0.000000e+00> : vector<2x128xf32>
    %23 = tpu.matmul %22, %21, %cst_20 {dimension_numbers = #tpu.dot_dimension_numbers<[1], [0], [0], [1], [0, 0, 1, 1], [], []>} : vector<2x12xf32>, vector<12x128xf32>, vector<2x128xf32> -> vector<2x128xf32>
    %c0_21 = arith.constant 0 : index
    %c0_22 = arith.constant 0 : index
    %24 = vector.load %arg9[%c0_21, %c0_22] : memref<2x1xf32, #tpu.memory_space<vmem>>, vector<2x1xf32>
    %25 = vector.broadcast %24 : vector<2x1xf32> to vector<2x128xf32>
    %26 = arith.addf %23, %25 : vector<2x128xf32>
    %c0_23 = arith.constant 0 : index
    %c0_24 = arith.constant 0 : index
    %27 = vector.load %arg10[%c0_23, %c0_24] : memref<2x128xf32, #tpu.memory_space<vmem>>, vector<2x128xf32>
    tpu.vector_store %arg10[%c0_23, %c0_24], %26 {strides = array<i32>} : memref<2x128xf32, #tpu.memory_space<vmem>>, vector<2x128xf32>,
    return
  }
  func.func @transform_0(%arg0: i32) -> (i32, i32) {
    %c0_i32 = arith.constant 0 : i32
    %c0_i32_0 = arith.constant 0 : i32
    return %c0_i32, %arg0 : i32, i32
  }
  func.func @transform_1(%arg0: i32) -> (i32, i32) {
    %c0_i32 = arith.constant 0 : i32
    %c0_i32_0 = arith.constant 0 : i32
    %c0_i32_1 = arith.constant 0 : i32
    return %c0_i32, %c0_i32_0 : i32, i32
  }
  func.func @transform_2(%arg0: i32) -> (i32, i32) {
    %c0_i32 = arith.constant 0 : i32
    %c0_i32_0 = arith.constant 0 : i32
    %c0_i32_1 = arith.constant 0 : i32
    return %c0_i32, %c0_i32_0 : i32, i32
  }
  func.func @transform_3(%arg0: i32) -> (i32, i32) {
    %c0_i32 = arith.constant 0 : i32
    %c0_i32_0 = arith.constant 0 : i32
    %c0_i32_1 = arith.constant 0 : i32
    return %c0_i32, %c0_i32_0 : i32, i32
  }
  func.func @transform_4(%arg0: i32) -> (i32, i32) {
    %c0_i32 = arith.constant 0 : i32
    %c0_i32_0 = arith.constant 0 : i32
    %c0_i32_1 = arith.constant 0 : i32
    return %c0_i32, %c0_i32_0 : i32, i32
  }
  func.func @transform_5(%arg0: i32) -> (i32, i32) {
    %c0_i32 = arith.constant 0 : i32
    %c0_i32_0 = arith.constant 0 : i32
    %c0_i32_1 = arith.constant 0 : i32
    return %c0_i32, %c0_i32_0 : i32, i32
  }
  func.func @transform_6(%arg0: i32) -> (i32, i32) {
    %c0_i32 = arith.constant 0 : i32
    %c0_i32_0 = arith.constant 0 : i32
    %c0_i32_1 = arith.constant 0 : i32
    return %c0_i32, %c0_i32_0 : i32, i32
  }
  func.func @transform_7(%arg0: i32) -> (i32, i32) {
    %c0_i32 = arith.constant 0 : i32
    %c0_i32_0 = arith.constant 0 : i32
    %c0_i32_1 = arith.constant 0 : i32
    return %c0_i32, %c0_i32_0 : i32, i32
  }
  func.func @transform_8(%arg0: i32) -> (i32, i32) {
    %c0_i32 = arith.constant 0 : i32
    %c0_i32_0 = arith.constant 0 : i32
    %c0_i32_1 = arith.constant 0 : i32
    return %c0_i32, %c0_i32_0 : i32, i32
  }
  func.func @transform_9(%arg0: i32) -> (i32, i32) {
    %c0_i32 = arith.constant 0 : i32
    %c0_i32_0 = arith.constant 0 : i32
    return %c0_i32, %arg0 : i32, i32
  }
}

</mosaic_0001>

<bundles_post_ra>
// kernel: tpu_custom_call.1
= control target key start
LH: loop header
LB: loop body
LE: loop exit
PB: predicated region body
PF: predicated region fallthrough
CT: control target
= control target key end

     0   :  { %vm65_vm0 = vcmask 1043456   ;;  %vm55_vm1 = vcmask 31744   ;;  %v296_v2 = vmov 0   ;;  %s418_s0 = inlined_call_operand.vmem [shape: f32[4,128], index: 0, kind: input, shape index: {}]   ;;  %s419_s1 = inlined_call_operand.vmem [shape: f32[24,4], index: 1, kind: input, shape index: {}]   ;;  %s420_s2 = inlined_call_operand.vmem [shape: f32[24,1], index: 2, kind: input, shape index: {}]   ;;  %s421_s3 = inlined_call_operand.vmem [shape: f32[24,24], index: 3, kind: input, shape index: {}]   ;;  %s422_s4 = inlined_call_operand.vmem [shape: f32[24,1], index: 4, kind: input, shape index: {}]   ;;  %s423_s5 = inlined_call_operand.vmem [shape: f32[12,24], index: 5, kind: input, shape index: {}]   ;;  %s424_s6 = inlined_call_operand.vmem [shape: f32[12,1], index: 6, kind: input, shape index: {}]   ;;  %s425_s7 = inlined_call_operand.vmem [shape: f32[2,12], index: 7, kind: input, shape index: {}]   ;;  %s426_s8 = inlined_call_operand.vmem [shape: f32[2,1], index: 8, kind: input, shape index: {}]   ;;  %s427_s9 = inlined_call_operand.hbm [shape: f32[2,128], index: 9, kind: output, shape index: {}]  }
   0x1   :  { %v33_v0 = vld [vmem:[%s418_s0] sm:$0xf]  ;;  %267 = vset.pattern.permute.xlu0 %v296_v2  ;;  %v39_v3 = vld [vmem:[%s420_s2 + $0x10] sm:$0xff]  ;;  %268 = vset.pattern.permute.xlu1 %v296_v2 }
   0x2   :  { %v34_v1 = vld [vmem:[%s419_s1] sm:$0xff]  ;;  %254 = vmatpush.msk.msra.mxu0 %vm65_vm0, %v33_v0  ;;  %52 = vperm.xlu0 %267, %v39_v3  }
   0x3   :  { %v37_v4 = vld [vmem:[%s420_s2] sm:$0xff]  ;;  %255 = vmatmul.msk.f32.vlgmr.msra.gmra.mxu0 %vm55_vm1, %v34_v1  ;;  %269 = vset.pattern.permute.xlu2 %v296_v2 }
   0x4   :  { %14 = vsyncpa [#allocation3], 0  ;;  %42 = vperm.xlu1 %268, %v37_v4   ;;  %v35_v5 = vld [vmem:[%s419_s1 + $0x8] sm:$0xff]  ;;  %v103_v7 = vld [vmem:[%s422_s4 + $0x10] sm:$0xff]  ;;  %vm119_vm2 = vcmask 195584   ;;  %vm210_vm3 = vcmask 97280  }
   0x5   :  { %v38_v6 = vld [vmem:[%s420_s2 + $0x8] sm:$0xff]  ;;  %v36_v8 = vld [vmem:[%s419_s1 + $0x10] sm:$0xff]  ;;  %v160_v10 = vld [vmem:[%s424_s6] sm:$0xff]  ;;  %s245_s21 = sshll.u32 %s427_s9, 4  ;;  %s246_s21 = int_to_ptr.hbm [resolvable:$true] %s245_s21 }
   0x6   :  { %v161_v9 = vld [vmem:[%s424_s6 + $0x8] sm:$0xf]  ;;  %v101_v18 = vld [vmem:[%s422_s4] sm:$0xff]  ;;  %v100_v28 = vld [vmem:[%s421_s3 + $0x10] sm:$0xff] }
   0x7   :  { %v102_v14 = vld [vmem:[%s422_s4 + $0x8] sm:$0xff]  ;;  %v98_v25 = vld [vmem:[%s421_s3] sm:$0xff] }
   0x8   :  { %111 = vperm.xlu2 %269, %v102_v14   ;;  %v204_v26 = vld [vmem:[%s426_s8] sm:$0x3]  ;;  %v99_v27 = vld [vmem:[%s421_s3 + $0x8] sm:$0xff] }
   0x9   :  { %v158_v41 = vld [vmem:[%s423_s5] sm:$0xff]  ;;  %v159_v42 = vld [vmem:[%s423_s5 + $0x8] sm:$0xf]  ;;  %s297_s5 = smov [#allocation2]  }
   0xa   :  { %47 = vperm.xlu0 %267, %v38_v6   ;;  %v203_v51 = vld [vmem:[%s425_s7] sm:$0x3]  ;;  %s243_s18 = sshll.u32 %s297_s5, 4  ;;  %s244_s18 = int_to_ptr.vmem [resolvable:$true] %s243_s18 }
   0xb   :  { %256 = vmatmul.msk.f32.gmra.mxu0 %vm55_vm1, %v35_v5 }
   0xc   :  { %116 = vperm.xlu1 %268, %v103_v7  }
  0x10   :  { %106 = vperm.xlu2 %269, %v101_v18  }
  0x12   :  { %169 = vperm.xlu0 %267, %v161_v9  }
  0x13   :  { %257 = vmatmul.msk.f32.gmra.mxu0 %vm55_vm1, %v36_v8 }
  0x14   :  { %164 = vperm.xlu1 %268, %v160_v10  }
  0x18   :  { %207 = vperm.xlu2 %269, %v204_v26  }
  0x62   :  { %v112_v30 = vpop.permute.xlu2 %111 }
  0x6a   :  { %v107_v33 = vpop.permute.xlu2 %106 }
  0x72   :  { %v208_v52 = vpop.permute.xlu2 %207 }
  0x74   :  { %v53_v12 = vpop.permute.xlu0 %52 }
  0x76   :  { %v43_v15 = vpop.permute.xlu1 %42 }
  0x7c   :  { %v48_v16 = vpop.permute.xlu0 %47 }
  0x7e   :  { %v117_v32 = vpop.permute.xlu1 %116 }
  0x80   :  { %v86_v11 = vpop.f32.mrf.mxu0 }
  0x81   :  { %v87_v21 = vadd.f32 %v86_v11, %v43_v15 }
  0x83   :  { %v95_v24 = vmax.f32 %v87_v21, 0.0 }
  0x84   :  { %v170_v44 = vpop.permute.xlu0 %169 }
  0x86   :  { %v165_v45 = vpop.permute.xlu1 %164 }
  0x88   :  { %v89_v13 = vpop.f32.mrf.mxu0 }
  0x89   :  { %v90_v19 = vadd.f32 %v89_v13, %v48_v16 }
  0x8b   :  { %v96_v23 = vmax.f32 %v90_v19, 0.0 }
  0x90   :  { %v92_v17 = vpop.f32.mrf.mxu0 }
  0x91   :  { %v93_v20 = vadd.f32 %v92_v17, %v53_v12 }
  0x93   :  { %v97_v22 = vmax.f32 %v93_v20, 0.0 }
  0x95   :  { %142 = vmatpush.msra.mxu1 %v97_v22 }
  0x97   :  { %143 = vmatpush.msra.mxu1 %v96_v23 }
  0x99   :  { %144 = vmatpush.msra.mxu1 %v95_v24 }
  0x9a   :  { %258 = vmatmul.msk.f32.vlgmr.msra.gmra.mxu1 %vm119_vm2, %v98_v25 }
  0xa2   :  { %259 = vmatmul.msk.f32.gmra.mxu1 %vm119_vm2, %v99_v27 }
  0xaa   :  { %260 = vmatmul.msk.f32.gmra.mxu1 %vm119_vm2, %v100_v28 }
 0x117   :  { %v146_v29 = vpop.f32.mrf.mxu1 }
 0x118   :  { %v147_v37 = vadd.f32 %v146_v29, %v107_v33 }
 0x11a   :  { %v155_v40 = vmax.f32 %v147_v37, 0.0 }
 0x11f   :  { %v149_v31 = vpop.f32.mrf.mxu1 }
 0x120   :  { %v150_v35 = vadd.f32 %v149_v31, %v112_v30 }
 0x122   :  { %v156_v39 = vmax.f32 %v150_v35, 0.0 }
 0x127   :  { %v152_v34 = vpop.f32.mrf.mxu1 }
 0x128   :  { %v153_v36 = vadd.f32 %v152_v34, %v117_v32 }
 0x12a   :  { %v157_v38 = vmax.f32 %v153_v36, 0.0 }
 0x12c   :  { %191 = vmatpush.msra.mxu2 %v157_v38 }
 0x12e   :  { %192 = vmatpush.msra.mxu2 %v156_v39 }
 0x130   :  { %193 = vmatpush.msra.mxu2 %v155_v40 }
 0x131   :  { %261 = vmatmul.msk.f32.vlgmr.msra.gmra.mxu2 %vm119_vm2, %v158_v41 }
 0x139   :  { %262 = vmatmul.msk.f32.gmra.mxu2 %vm119_vm2, %v159_v42 }
 0x1b4   :  { %v195_v43 = vpop.f32.mrf.mxu2 }
 0x1b5   :  { %v196_v47 = vadd.f32 %v195_v43, %v165_v45 }
 0x1b7   :  { %v201_v50 = vmax.f32 %v196_v47, 0.0 }
 0x1bc   :  { %v198_v46 = vpop.f32.mrf.mxu2 }
 0x1bd   :  { %v199_v48 = vadd.f32 %v198_v46, %v170_v44 }
 0x1bf   :  { %v202_v49 = vmax.f32 %v199_v48, 0.0 }
 0x1c1   :  { %263 = vmatpush.msk.msra.mxu3 %vm65_vm0, %v202_v49 }
 0x1c3   :  { %232 = vmatpush.msra.mxu3 %v201_v50 }
 0x1c4   :  { %264 = vmatmul.msk.f32.vlgmr.msra.gmra.mxu3 %vm210_vm3, %v203_v51 }
 0x247   :  { %v234_v53 = vpop.f32.mrf.mxu3 }
 0x248   :  { %v235_v54 = vadd.f32 %v234_v53, %v208_v52 }
 0x24a   :  { %237 = vst [vmem:[#allocation2] sm:$0x3] %v235_v54 }
 0x24b   :  { %248 = dma.vmem_to_hbm [thread:$0]  %s244_s18, 32, %s246_s21, [#allocation3]  }
 0x24c   :  { %294 = dma.done.wait [#allocation3], 32  }
 0x24d   :  { %295 = vsyncadd [#allocation3], 4294967264 }
 0x24e   :  { %253 = vsyncpa [#allocation3], 1 }

</bundles_post_ra>
